<compile_context>
chip_gen: v6e
topology: v6e:2x2x1
jax: 0.10.0
libtpu: 0.0.40
codegen_flags: <defaults>
</compile_context>

<pallas_src>
import functools

import jax
import jax.numpy as jnp
from jax.experimental import pallas as pl
from jax.experimental.pallas import tpu as pltpu

_SUB, _LANE = 8, 128
_CHUNK = _SUB * _LANE  # 1024 elements per dense (8, 128) vreg tile


def mix_kernel(w_ref, b_ref, x_ref, o_ref, *, cin, cout):
    # w_ref: SMEM (cout*cin,) f32     b_ref: SMEM (cout,) f32
    # x_ref: VMEM (cin, t_blk, 8, 128) o_ref: VMEM (cout, t_blk, 8, 128)
    for co in range(cout):                      # static unroll: cout*cin FMAs
        acc = x_ref[0].astype(jnp.float32) * w_ref[co * cin]
        for ci in range(1, cin):
            acc = acc + x_ref[ci].astype(jnp.float32) * w_ref[co * cin + ci]
        o_ref[co] = (acc + b_ref[co]).astype(o_ref.dtype)   # direct dense store


def _pick_chunk_tile(num_chunks, n_batch, cin, cout, itemsize,
                     vmem_budget_bytes):
    """Number of (8,128) chunks per grid step.

    Sized so the double-buffered input+output block footprint stays under
    vmem_budget_bytes (default ~12 MiB -> safe on v5e's 16 MiB scoped default
    and v7x's smaller VMEM), while keeping multi-MiB per step.
    """
    bytes_per_chunk = (cin + cout) * _CHUNK * itemsize
    max_chunks = max(int(vmem_budget_bytes // (2 * bytes_per_chunk)), 1)
    t_blk = min(num_chunks, max_chunks)
    # v7x: keep at least 2 total grid steps so both TensorCores get work.
    if n_batch * pl.cdiv(num_chunks, t_blk) < 2 and num_chunks > 1:
        t_blk = pl.cdiv(num_chunks, 2)
    return t_blk


def mix_forward(x_nchw, weight, bias, *, vmem_budget_bytes=12 << 20):
    """Mix.forward (1x1 conv dim -> dim//2) via Pallas.

    x_nchw: (N, Cin, H, W)
    weight: (Cout, Cin)   -- PyTorch conv weight (Cout, Cin, 1, 1) squeezed
    bias:   (Cout,)
    returns (N, Cout, H, W)
    """
    N, Cin, H, W = x_nchw.shape
    Cout, wcin = weight.shape
    assert wcin == Cin
    S = H * W

    # Fold spatial into dense (chunks, 8, 128) tiles: lane- AND sublane-dense.
    S_pad = pl.cdiv(S, _CHUNK) * _CHUNK
    x = x_nchw.reshape(N, Cin, S)
    if S_pad != S:
        x = jnp.pad(x, ((0, 0), (0, 0), (0, S_pad - S)))
    num_chunks = S_pad // _CHUNK
    x = x.reshape(N, Cin, num_chunks, _SUB, _LANE)

    itemsize = jnp.dtype(x_nchw.dtype).itemsize
    t_blk = _pick_chunk_tile(num_chunks, N, Cin, Cout, itemsize,
                             vmem_budget_bytes)
    n_s_tiles = pl.cdiv(num_chunks, t_blk)   # ragged tail handled by Pallas

    # Tiny weights/bias live in SMEM as 32-bit scalars (flattened 1D to avoid
    # 2D SMEM padding); they feed the VPU FMAs directly.
    w_sm = weight.reshape(Cout * Cin).astype(jnp.float32)
    b_sm = bias.reshape(Cout).astype(jnp.float32)

    kernel = functools.partial(mix_kernel, cin=Cin, cout=Cout)

    out = pl.pallas_call(
        kernel,
        out_shape=jax.ShapeDtypeStruct((N, Cout, num_chunks, _SUB, _LANE),
                                       x_nchw.dtype),
        grid_spec=pltpu.PrefetchScalarGridSpec(
            num_scalar_prefetch=0,
            grid=(N, n_s_tiles),
            in_specs=[
                pl.BlockSpec(memory_space=pltpu.MemorySpace.SMEM),  # weight
                pl.BlockSpec(memory_space=pltpu.MemorySpace.SMEM),  # bias
                # (batch squeezed, all Cin, chunk tile, dense 8x128)
                pl.BlockSpec((None, Cin, t_blk, _SUB, _LANE),
                             lambda n, s: (n, 0, s, 0, 0)),
            ],
            out_specs=pl.BlockSpec((None, Cout, t_blk, _SUB, _LANE),
                                   lambda n, s: (n, 0, s, 0, 0)),
        ),
        compiler_params=pltpu.CompilerParams(
            dimension_semantics=("parallel", "parallel")),
    )(w_sm, b_sm, x)

    out = out.reshape(N, Cout, S_pad)
    if S_pad != S:
        out = out[:, :, :S]          # drop the zero-padded (bias-only) tail
    return out.reshape(N, Cout, H, W)


if __name__ == "__main__":
    key = jax.random.PRNGKey(0)
    k_x, k_w, k_b = jax.random.split(key, 3)

    # Module config: Mix(dim=4) -> Conv2d(4, 2, kernel_size=1)
    N, dim, Hh, Ww = 2, 4, 16, 16
    Cout = dim // 2

    x = jax.random.normal(k_x, (N, dim, Hh, Ww), dtype=jnp.float32)

    # Deterministic "init": kaiming-uniform-like bound for a 1x1 conv.
    fan_in = dim  # Cin * 1 * 1
    bound = 1.0 / jnp.sqrt(fan_in)
    weight = jax.random.uniform(k_w, (Cout, dim), jnp.float32, -bound, bound)
    bias = jax.random.uniform(k_b, (Cout,), jnp.float32, -bound, bound)

    y = mix_forward(x, weight, bias)
    jax.block_until_ready(y)

    # Reference check (plain JAX einsum == 1x1 conv).
    y_ref = jnp.einsum("nchw,oc->nohw", x, weight) + bias[None, :, None, None]
    assert y.shape == (N, Cout, Hh, Ww)
    assert jnp.allclose(y, y_ref, atol=1e-5, rtol=1e-5)

    print("KERNEL_OK")
</pallas_src>

<mosaic_0001>
module attributes {stable_mosaic.version = 11 : i64} {
  func.func @mix_kernel(%arg0: i32, %arg1: i32, %arg2: memref<8xf32, #tpu.memory_space<smem>>, %arg3: memref<2xf32, #tpu.memory_space<smem>>, %arg4: memref<1x4x1x8x128xf32, #tpu.memory_space<vmem>>, %arg5: memref<1x2x1x8x128xf32, #tpu.memory_space<vmem>>) attributes {dimension_semantics = [#tpu.dimension_semantics<parallel>, #tpu.dimension_semantics<parallel>], iteration_bounds = array<i64: 2, 1>, scalar_prefetch = 0 : i64, scratch_operands = 0 : i64, tpu.core_type = #tpu.core_type<tc>, window_params = [{transform_indices = @transform_0, window_bounds = array<i64: 8>}, {transform_indices = @transform_1, window_bounds = array<i64: 2>}, {transform_indices = @transform_2, window_bounds = array<i64: 1, 4, 1, 8, 128>}, {transform_indices = @transform_3, window_bounds = array<i64: 1, 2, 1, 8, 128>}]} {
    %c0 = arith.constant 0 : index
    %c0_0 = arith.constant 0 : index
    %c0_1 = arith.constant 0 : index
    %c0_2 = arith.constant 0 : index
    %c0_3 = arith.constant 0 : index
    %0 = vector.load %arg4[%c0, %c0_0, %c0_1, %c0_2, %c0_3] : memref<1x4x1x8x128xf32, #tpu.memory_space<vmem>>, vector<1x1x1x8x128xf32>
    %1 = vector.shape_cast %0 : vector<1x1x1x8x128xf32> to vector<1x8x128xf32>
    %c0_4 = arith.constant 0 : index
    %2 = memref.load %arg2[%c0_4] : memref<8xf32, #tpu.memory_space<smem>>
    %3 = vector.broadcast %2 : f32 to vector<1x8x128xf32>
    %4 = arith.mulf %1, %3 : vector<1x8x128xf32>
    %c0_5 = arith.constant 0 : index
    %c1 = arith.constant 1 : index
    %c0_6 = arith.constant 0 : index
    %c0_7 = arith.constant 0 : index
    %c0_8 = arith.constant 0 : index
    %5 = vector.load %arg4[%c0_5, %c1, %c0_6, %c0_7, %c0_8] : memref<1x4x1x8x128xf32, #tpu.memory_space<vmem>>, vector<1x1x1x8x128xf32>
    %6 = vector.shape_cast %5 : vector<1x1x1x8x128xf32> to vector<1x8x128xf32>
    %c1_9 = arith.constant 1 : index
    %7 = memref.load %arg2[%c1_9] : memref<8xf32, #tpu.memory_space<smem>>
    %8 = vector.broadcast %7 : f32 to vector<1x8x128xf32>
    %9 = arith.mulf %6, %8 : vector<1x8x128xf32>
    %10 = arith.addf %4, %9 : vector<1x8x128xf32>
    %c0_10 = arith.constant 0 : index
    %c2 = arith.constant 2 : index
    %c0_11 = arith.constant 0 : index
    %c0_12 = arith.constant 0 : index
    %c0_13 = arith.constant 0 : index
    %11 = vector.load %arg4[%c0_10, %c2, %c0_11, %c0_12, %c0_13] : memref<1x4x1x8x128xf32, #tpu.memory_space<vmem>>, vector<1x1x1x8x128xf32>
    %12 = vector.shape_cast %11 : vector<1x1x1x8x128xf32> to vector<1x8x128xf32>
    %c2_14 = arith.constant 2 : index
    %13 = memref.load %arg2[%c2_14] : memref<8xf32, #tpu.memory_space<smem>>
    %14 = vector.broadcast %13 : f32 to vector<1x8x128xf32>
    %15 = arith.mulf %12, %14 : vector<1x8x128xf32>
    %16 = arith.addf %10, %15 : vector<1x8x128xf32>
    %c0_15 = arith.constant 0 : index
    %c3 = arith.constant 3 : index
    %c0_16 = arith.constant 0 : index
    %c0_17 = arith.constant 0 : index
    %c0_18 = arith.constant 0 : index
    %17 = vector.load %arg4[%c0_15, %c3, %c0_16, %c0_17, %c0_18] : memref<1x4x1x8x128xf32, #tpu.memory_space<vmem>>, vector<1x1x1x8x128xf32>
    %18 = vector.shape_cast %17 : vector<1x1x1x8x128xf32> to vector<1x8x128xf32>
    %c3_19 = arith.constant 3 : index
    %19 = memref.load %arg2[%c3_19] : memref<8xf32, #tpu.memory_space<smem>>
    %20 = vector.broadcast %19 : f32 to vector<1x8x128xf32>
    %21 = arith.mulf %18, %20 : vector<1x8x128xf32>
    %22 = arith.addf %16, %21 : vector<1x8x128xf32>
    %c0_20 = arith.constant 0 : index
    %23 = memref.load %arg3[%c0_20] : memref<2xf32, #tpu.memory_space<smem>>
    %24 = vector.broadcast %23 : f32 to vector<1x8x128xf32>
    %25 = arith.addf %22, %24 : vector<1x8x128xf32>
    %c0_21 = arith.constant 0 : index
    %c0_22 = arith.constant 0 : index
    %c0_23 = arith.constant 0 : index
    %c0_24 = arith.constant 0 : index
    %c0_25 = arith.constant 0 : index
    %26 = vector.load %arg5[%c0_21, %c0_22, %c0_23, %c0_24, %c0_25] : memref<1x2x1x8x128xf32, #tpu.memory_space<vmem>>, vector<1x1x1x8x128xf32>
    %27 = vector.shape_cast %26 : vector<1x1x1x8x128xf32> to vector<1x8x128xf32>
    %28 = vector.shape_cast %25 : vector<1x8x128xf32> to vector<1x1x1x8x128xf32>
    tpu.vector_store %arg5[%c0_21, %c0_22, %c0_23, %c0_24, %c0_25], %28 {strides = array<i32>} : memref<1x2x1x8x128xf32, #tpu.memory_space<vmem>>, vector<1x1x1x8x128xf32>,
    %c0_26 = arith.constant 0 : index
    %c0_27 = arith.constant 0 : index
    %c0_28 = arith.constant 0 : index
    %c0_29 = arith.constant 0 : index
    %c0_30 = arith.constant 0 : index
    %29 = vector.load %arg4[%c0_26, %c0_27, %c0_28, %c0_29, %c0_30] : memref<1x4x1x8x128xf32, #tpu.memory_space<vmem>>, vector<1x1x1x8x128xf32>
    %30 = vector.shape_cast %29 : vector<1x1x1x8x128xf32> to vector<1x8x128xf32>
    %c4 = arith.constant 4 : index
    %31 = memref.load %arg2[%c4] : memref<8xf32, #tpu.memory_space<smem>>
    %32 = vector.broadcast %31 : f32 to vector<1x8x128xf32>
    %33 = arith.mulf %30, %32 : vector<1x8x128xf32>
    %c0_31 = arith.constant 0 : index
    %c1_32 = arith.constant 1 : index
    %c0_33 = arith.constant 0 : index
    %c0_34 = arith.constant 0 : index
    %c0_35 = arith.constant 0 : index
    %34 = vector.load %arg4[%c0_31, %c1_32, %c0_33, %c0_34, %c0_35] : memref<1x4x1x8x128xf32, #tpu.memory_space<vmem>>, vector<1x1x1x8x128xf32>
    %35 = vector.shape_cast %34 : vector<1x1x1x8x128xf32> to vector<1x8x128xf32>
    %c5 = arith.constant 5 : index
    %36 = memref.load %arg2[%c5] : memref<8xf32, #tpu.memory_space<smem>>
    %37 = vector.broadcast %36 : f32 to vector<1x8x128xf32>
    %38 = arith.mulf %35, %37 : vector<1x8x128xf32>
    %39 = arith.addf %33, %38 : vector<1x8x128xf32>
    %c0_36 = arith.constant 0 : index
    %c2_37 = arith.constant 2 : index
    %c0_38 = arith.constant 0 : index
    %c0_39 = arith.constant 0 : index
    %c0_40 = arith.constant 0 : index
    %40 = vector.load %arg4[%c0_36, %c2_37, %c0_38, %c0_39, %c0_40] : memref<1x4x1x8x128xf32, #tpu.memory_space<vmem>>, vector<1x1x1x8x128xf32>
    %41 = vector.shape_cast %40 : vector<1x1x1x8x128xf32> to vector<1x8x128xf32>
    %c6 = arith.constant 6 : index
    %42 = memref.load %arg2[%c6] : memref<8xf32, #tpu.memory_space<smem>>
    %43 = vector.broadcast %42 : f32 to vector<1x8x128xf32>
    %44 = arith.mulf %41, %43 : vector<1x8x128xf32>
    %45 = arith.addf %39, %44 : vector<1x8x128xf32>
    %c0_41 = arith.constant 0 : index
    %c3_42 = arith.constant 3 : index
    %c0_43 = arith.constant 0 : index
    %c0_44 = arith.constant 0 : index
    %c0_45 = arith.constant 0 : index
    %46 = vector.load %arg4[%c0_41, %c3_42, %c0_43, %c0_44, %c0_45] : memref<1x4x1x8x128xf32, #tpu.memory_space<vmem>>, vector<1x1x1x8x128xf32>
    %47 = vector.shape_cast %46 : vector<1x1x1x8x128xf32> to vector<1x8x128xf32>
    %c7 = arith.constant 7 : index
    %48 = memref.load %arg2[%c7] : memref<8xf32, #tpu.memory_space<smem>>
    %49 = vector.broadcast %48 : f32 to vector<1x8x128xf32>
    %50 = arith.mulf %47, %49 : vector<1x8x128xf32>
    %51 = arith.addf %45, %50 : vector<1x8x128xf32>
    %c1_46 = arith.constant 1 : index
    %52 = memref.load %arg3[%c1_46] : memref<2xf32, #tpu.memory_space<smem>>
    %53 = vector.broadcast %52 : f32 to vector<1x8x128xf32>
    %54 = arith.addf %51, %53 : vector<1x8x128xf32>
    %c0_47 = arith.constant 0 : index
    %c1_48 = arith.constant 1 : index
    %c0_49 = arith.constant 0 : index
    %c0_50 = arith.constant 0 : index
    %c0_51 = arith.constant 0 : index
    %55 = vector.load %arg5[%c0_47, %c1_48, %c0_49, %c0_50, %c0_51] : memref<1x2x1x8x128xf32, #tpu.memory_space<vmem>>, vector<1x1x1x8x128xf32>
    %56 = vector.shape_cast %55 : vector<1x1x1x8x128xf32> to vector<1x8x128xf32>
    %57 = vector.shape_cast %54 : vector<1x8x128xf32> to vector<1x1x1x8x128xf32>
    tpu.vector_store %arg5[%c0_47, %c1_48, %c0_49, %c0_50, %c0_51], %57 {strides = array<i32>} : memref<1x2x1x8x128xf32, #tpu.memory_space<vmem>>, vector<1x1x1x8x128xf32>,
    return
  }
  func.func @transform_0(%arg0: i32, %arg1: i32) -> i32 {
    %c0_i32 = arith.constant 0 : i32
    %c0_i32_0 = arith.constant 0 : i32
    return %c0_i32 : i32
  }
  func.func @transform_1(%arg0: i32, %arg1: i32) -> i32 {
    %c0_i32 = arith.constant 0 : i32
    %c0_i32_0 = arith.constant 0 : i32
    return %c0_i32 : i32
  }
  func.func @transform_2(%arg0: i32, %arg1: i32) -> (i32, i32, i32, i32, i32) {
    %c0_i32 = arith.constant 0 : i32
    %c0_i32_0 = arith.constant 0 : i32
    %c0_i32_1 = arith.constant 0 : i32
    %c0_i32_2 = arith.constant 0 : i32
    return %arg0, %c0_i32, %arg1, %c0_i32_0, %c0_i32_1 : i32, i32, i32, i32, i32
  }
  func.func @transform_3(%arg0: i32, %arg1: i32) -> (i32, i32, i32, i32, i32) {
    %c0_i32 = arith.constant 0 : i32
    %c0_i32_0 = arith.constant 0 : i32
    %c0_i32_1 = arith.constant 0 : i32
    %c0_i32_2 = arith.constant 0 : i32
    return %arg0, %c0_i32, %arg1, %c0_i32_0, %c0_i32_1 : i32, i32, i32, i32, i32
  }
}

</mosaic_0001>

<bundles_post_ra>
// kernel: tpu_custom_call.1
= control target key start
LH: loop header
LB: loop body
LE: loop exit
PB: predicated region body
PF: predicated region fallthrough
CT: control target
= control target key end

     0   :  { %s884_s0 = inlined_call_operand.hbm [shape: f32[8], index: 0, kind: input, shape index: {}]   ;;  %s885_s1 = inlined_call_operand.vmem [shape: f32[2], index: 1, kind: input, shape index: {}]   ;;  %s886_s2 = inlined_call_operand.hbm [shape: f32[2,4,1,8,128], index: 2, kind: input, shape index: {}]   ;;  %s887_s3 = inlined_call_operand.hbm [shape: f32[2,2,1,8,128], index: 3, kind: output, shape index: {}]  }
   0x1   :  { %889 = sst [smem:[#allocation14_spill]] %s884_s0 }
   0x2   :  { %8 = vsyncpa [#allocation5], 0 }
   0x3   :  { %9 = vsyncpa [#allocation6], 0 }
   0x4   :  { %10 = vsyncpa [#allocation3], 0 }
   0x5   :  { %12 = vsyncpa [#allocation3 + $0x1], 0 }
   0x6   :  { %13 = vsyncpa [#allocation4], 0 }
   0x7   :  { %15 = vsyncpa [#allocation4 + $0x1], 0  ;;  %s700_s12 = smov 0   ;;  %s702_s13 = smov 0  }
   0x8   :  { %s704_s14 = smov 0   ;;  %s706_s15 = smov 0  }
   0x9   :  { %s708_s16 = smov 0   ;;  %s710_s17 = smov 0  }
   0xa LB: > { %s405_s18 = sadd.s32 4294967295, %s670_s17   ;;  %s406_s19 = sadd.s32 4294967294, %s670_s17   ;;  %s670_s17 = sphi %s710_s17, %s21_s17   ;;  %s666_s16 = sphi %s708_s16, %s905_s16   ;;  %s662_s15 = sphi %s706_s15, %s904_s15   ;;  %s658_s14 = sphi %s704_s14, %s903_s14   ;;  %s654_s13 = sphi %s702_s13, %s902_s13   ;;  %s650_s12 = sphi %s700_s12, %s901_s12  }
   0xb   : > { %s84_s20 = sadd.s32 1, %s658_s14  ;;  %p91_p0 = scmp.ne.s32.totalorder %s658_s14, %s654_s13 }
   0xc   : > { %p92_p1 = scmp.eq.s32.totalorder %s670_s17, 0  ;;  %p97_p2 = scmp.ne.s32.totalorder %s654_s13, %s650_s12 }
   0xd   : > { %p738_p3 = scmp.eq.s32.totalorder %s405_s18, 0  ;;  %p123_p4 = scmp.eq.s32.totalorder %s405_s18, 1 }
   0xe   : > { %p93_p5 = por %p92_p1, %p91_p0  ;;  %p129_p6 = scmp.eq.s32.totalorder %s406_s19, 1 }
   0xf   : > { %p744_p7 = por %p738_p3, %p97_p2  ;;  %p748_p8 = por %p123_p4, %p91_p0 }
  0x10   : > { %p752_p9 = por %p129_p6, %p97_p2  ;;  %p407_p10 = scmp.ge.s32.totalorder %s670_s17, 1 }
  0x11   : > { %s892_s23 = scalar_select %p748_p8, 1, 0 }
  0x12   : > { %s893_s24 = scalar_select %p752_p9, 1, 0 }
  0x13   : > { %p136_p11 = scmp.lt.s32.totalorder %s670_s17, 3  ;;  %p470_p1 = scmp.lt.s32.totalorder %s670_s17, 2 }
  0x14   : > { %s158_s28 = sshll.u32 %s885_s1, 4  ;;  %s169_s4 = sand.u32 1, %s658_s14   ;;  %s159_s28 = int_to_ptr.vmem [resolvable:$true] %s158_s28 }
  0x15   : > { %p759_p13 = pnand %p407_p10, %p136_p11  ;;  %p769_p4 = pnand %p470_p1, %p93_p5 }
  0x16   : > { %s33_s5 = sadd.s32 1, %s666_s16  ;;  %s672_s6 = smov [#allocation2]  }
  0x17   : > { %p453_p0 = pneg %p759_p13  ;;  %s897_s0 = sld [smem:[#allocation14_spill]] }
  0x18   : > { %s539_s9 = scalar_lea.vmem %s159_s28, 16  ;;  %p547_p1 = scmp.lt.s32.totalorder %s159_s28, %s159_s28 }
  0x19   : > { %p775_p2 = pnand %p453_p0, %p738_p3  ;;  %p540_p5 = scmp.ne.s32.totalorder %s159_s28, %s539_s9 }
  0x1a   : > { %p548_p0 = scmp.lt.s32.totalorder %s539_s9, %s539_s9 }
  0x1b   : > { %p541_p6 = pneg %p775_p2 }
  0x1c   : > { %p549_p12 = por %p548_p0, %p547_p1 }
  0x1d   : > { %456 = dma.hbm_to_smem (!%p775_p2), %s897_s0, 16, %s672_s6, [#allocation5]  }
  0x1e   : > { %p542_p10 = pnand %p541_p6, %p540_p5 }
  0x20   : > { %p543_p11 = pneg %p542_p10 }
  0x22   : > { %p550_p9 = pnand %p549_p12, %p543_p11 }
  0x24   : > { %553 = shalt.err (!%p550_p9)
}
  0x25   : > { %s673_s10 = smov [#allocation7]   ;;  %p35_p8 = scmp.ge.s32.totalorder %s33_s5, 2 }
  0x26   : > { %459 = dma.vmem_to_smem (!%p775_p2), %s159_s28, 16, %s673_s10, [#allocation6]  }
  0x27   : > { %s411_s11 = sshll.u32 %s169_s4, 5  ;;  %s439_s18 = sshll.u32 %s666_s16, 9 }
  0x28   : > { %s907_s5 = smov (%p35_p8, %s33_s5), 0  ;;  %s180_s27 = scalar_lea.hbm %s886_s2, %s439_s18 }
  0x29   : > { %s79_s6 = ssub.s32 %s666_s16, %s907_s5  ;;  %s173_s7 = scalar_lea.vmem [#allocation8], %s411_s11 }
  0x2a   : > { %s181_s8 = sshll.u32 %s173_s7, 4  ;;  %p82_p9 = scmp.eq.s32.totalorder %s79_s6, 0  ;;  %s182_s8 = int_to_ptr.vmem [resolvable:$true] %s181_s8 }
  0x2b   : > { %s170_s9 = scalar_lea.sflag [#allocation3], %s169_s4  ;;  %p556_p12 = pneg %p769_p4 }
  0x2c   : > { %s801_s30 = scalar_select %p82_p9, %s658_s14, %s84_s20  }
  0x2d   : > { %s567_s28 = scalar_lea.vmem %s182_s8, 512  ;;  %s674_s10 = smov [#allocation8]  }
  0x2e   : > { %p568_p2 = scmp.ne.s32.totalorder %s182_s8, %s567_s28  ;;  %s572_s0 = sshll.u32 %s674_s10, 4  ;;  %s573_s0 = int_to_ptr.vmem [resolvable:$false] %s572_s0 }
  0x2f   : > { %s574_s19 = scalar_lea.vmem %s573_s0, 1024  ;;  %p575_p6 = scmp.lt.s32.totalorder %s182_s8, %s573_s0 }
  0x30   : > { %p570_p8 = pnand %p568_p2, %p556_p12  ;;  %p576_p10 = scmp.lt.s32.totalorder %s574_s19, %s567_s28 }
  0x32   : > { %p571_p5 = pneg %p570_p8  ;;  %p577_p11 = por %p576_p10, %p575_p6 }
  0x34   : > { %p578_p1 = pnand %p577_p11, %p571_p5 }
  0x36   : > { %581 = shalt.err (!%p578_p1)
}
  0x37   : > { %s675_s11 = smov 128   ;;  %s676_s20 = smov 8  }
  0x38   : > { %463 = dma.hbm_to_vmem [thread:$0]  (!%p769_p4), %s180_s27, 512, %s182_s8, %s170_s9, %s675_s11, %s675_s11, %s676_s20  }
  0x39   : > { %193 = sbr.rel (%p759_p13) target bundleno = 108 (0x6c), region = 32 }
  0x3e   : > { %633 = dma.done.wait (%p738_p3), [#allocation5], 16  }
  0x3f   : > { %635 = vsyncadd (%p738_p3), [#allocation5], 4294967280 }
  0x40   : > { %637 = dma.done.wait (%p738_p3), [#allocation6], 16  }
  0x41   : > { %639 = vsyncadd (%p738_p3), [#allocation6], 4294967280  ;;  %s818_s0 = sand.u32 1, %s654_s13  }
  0x42   : > { %s417_s25 = sshll.u32 %s818_s0, 5  ;;  %s204_s29 = scalar_lea.sflag [#allocation3], %s818_s0 }
  0x43   : > { %s207_s4 = scalar_lea.vmem [#allocation8], %s417_s25 }
  0x44   : > { %641 = dma.done.wait (%p744_p7), %s204_s29, 512  }
  0x45   : > { %643 = vsyncadd (%p744_p7), %s204_s29, 4294966784 }
  0x46   : > { %212 = sfence }
  0x47   : > { %s232_s18 = sld [smem:[#allocation2]]  ;;  %v231_v0 = vld [vmem:[%s207_s4] sm:$0xff]  ;;  %v419_v1 = vld [vmem:[%s207_s4 + $0x8] sm:$0xff]  ;;  %v421_v3 = vld [vmem:[%s207_s4 + $0x10] sm:$0xff]  ;;  %s418_s28 = sshll.u32 %s818_s0, 4 }
  0x48   : > { %s420_s26 = sld [smem:[#allocation2 + $0x1]]  ;;  %v423_v6 = vld [vmem:[%s207_s4 + $0x18] sm:$0xff]  ;;  %s230_s19 = scalar_lea.vmem [#allocation9], %s418_s28 }
  0x49   : > { %s422_s27 = sld [smem:[#allocation2 + $0x2]]  ;;  %s296_s11 = sshll.u32 %s230_s19, 4  ;;  %s831_s11 = int_to_ptr.vmem [resolvable:$true] %s296_s11 }
  0x4a   : > { %s424_s21 = sld [smem:[#allocation2 + $0x3]]  ;;  %s440_s20 = sshll.u32 %s662_s15, 8 }
  0x4b   : > { %s826_s6 = sld [smem:[#allocation7]]  ;;  %s836_s4 = scalar_lea.hbm %s887_s3, %s440_s20 }
  0x4c   : > { %s425_s7 = sld [smem:[#allocation2 + $0x4]]  ;;  %p898_p7 = scmp.ne.s32.totalorder %s892_s23, 0 }
  0x4d   : > { %v233_v2 = vstv %s232_s18  ;;  %s427_s8 = sld [smem:[#allocation2 + $0x5]]  ;;  %s282_s18 = scalar_lea.sflag [#allocation4], %s818_s0 }
  0x4e   : > { %v234_v4 = vmul.f32 %v233_v2, %v231_v0  ;;  %v238_v5 = vstv %s420_s26  ;;  %s429_s22 = sld [smem:[#allocation2 + $0x6]]  ;;  %s582_s26 = scalar_lea.vmem %s831_s11, 256 }
  0x4f   : > { %v239_v7 = vmul.f32 %v419_v1, %v238_v5  ;;  %v244_v8 = vstv %s422_s27  ;;  %s431_s9 = sld [smem:[#allocation2 + $0x7]]  ;;  %p583_p3 = scmp.ne.s32.totalorder %s831_s11, %s582_s26 }
  0x50   : > { %v245_v9 = vmul.f32 %v421_v3, %v244_v8  ;;  %v250_v10 = vstv %s424_s21  ;;  %s432_s10 = sld [smem:[#allocation7 + $0x1]]  ;;  %s677_s15 = smov [#allocation9]  }
  0x51   : > { %v240_v11 = vadd.f32 %v239_v7, %v234_v4  ;;  %v251_v12 = vmul.f32 %v423_v6, %v250_v10  ;;  %v254_v17 = vstv %s826_s6  ;;  %p584_p13 = pnand %p583_p3, %p898_p7  ;;  %s586_s27 = sshll.u32 %s677_s15, 4  ;;  %s587_s27 = int_to_ptr.vmem [resolvable:$false] %s586_s27 }
  0x52   : > { %v259_v13 = vstv %s425_s7  ;;  %s588_s21 = scalar_lea.vmem %s587_s27, 512  ;;  %p589_p0 = scmp.lt.s32.totalorder %s831_s11, %s587_s27 }
  0x53   : > { %v246_v14 = vadd.f32 %v245_v9, %v240_v11  ;;  %v260_v15 = vmul.f32 %v259_v13, %v231_v0  ;;  %v263_v16 = vstv %s427_s8  ;;  %p585_p4 = pneg %p584_p13  ;;  %p590_p9 = scmp.lt.s32.totalorder %s588_s21, %s582_s26 }
  0x54   : > { %v264_v18 = vmul.f32 %v419_v1, %v263_v16  ;;  %v268_v19 = vstv %s429_s22 }
  0x55   : > { %v252_v20 = vadd.f32 %v251_v12, %v246_v14  ;;  %v269_v21 = vmul.f32 %v421_v3, %v268_v19  ;;  %v273_v22 = vstv %s431_s9  ;;  %p591_p12 = por %p590_p9, %p589_p0 }
  0x56   : > { %v265_v23 = vadd.f32 %v264_v18, %v260_v15  ;;  %v274_v24 = vmul.f32 %v423_v6, %v273_v22  ;;  %v277_v27 = vstv %s432_s10 }
  0x57   : > { %v255_v25 = vadd.f32 %v254_v17, %v252_v20  ;;  %p592_p2 = pnand %p591_p12, %p585_p4 }
  0x58   : > { %v270_v26 = vadd.f32 %v269_v21, %v265_v23 }
  0x59   : > { %256 = vst [vmem:[%s230_s19] sm:$0xff] %v255_v25 }
  0x5a   : > { %v275_v28 = vadd.f32 %v274_v24, %v270_v26 }
  0x5c   : > { %v278_v29 = vadd.f32 %v277_v27, %v275_v28 }
  0x5e   : > { %433 = vst [vmem:[%s230_s19 + $0x8] sm:$0xff] %v278_v29 }
  0x5f   : > { %595 = shalt.err (!%p592_p2)
}
  0x60   : > { %s596_s6 = scalar_lea.hbm %s836_s4, 256  ;;  %s600_s22 = scalar_lea.hbm %s887_s3, 512 }
  0x61   : > { %p597_p8 = scmp.ne.s32.totalorder %s836_s4, %s596_s6  ;;  %p601_p10 = scmp.lt.s32.totalorder %s836_s4, %s887_s3 }
  0x62   : > { %p602_p11 = scmp.lt.s32.totalorder %s600_s22, %s596_s6 }
  0x63   : > { %p598_p5 = pnand %p597_p8, %p898_p7 }
  0x64   : > { %p603_p1 = por %p602_p11, %p601_p10 }
  0x65   : > { %p599_p6 = pneg %p598_p5 }
  0x67   : > { %p604_p3 = pnand %p603_p1, %p599_p6 }
  0x69   : > { %607 = shalt.err (!%p604_p3)
}
  0x6a   : > { %s678_s10 = smov 128   ;;  %s679_s19 = smov 8  }
  0x6b   : > { %451 = dma.vmem_to_hbm [thread:$0]  (%p898_p7), %s831_s11, 256, %s836_s4, %s282_s18, %s678_s10, %s678_s10, %s679_s19  }
  0x6c PF: > { %s311_s20 = sand.u32 1, %s650_s12   ;;  %p899_p13 = scmp.ne.s32.totalorder %s893_s24, 0 }
  0x6d   : > { %p900_p4 = scmp.ge.s32.totalorder %s670_s17, 2  ;;  %s312_s25 = scalar_lea.sflag [#allocation4], %s311_s20 }
  0x6f   : > { %p465_p0 = pnand %p900_p4, %p899_p13 }
  0x71   : > { %p466_p9 = pneg %p465_p0 }
  0x73   : > { %645 = dma.done.wait (%p466_p9), %s312_s25, 256  }
  0x74   : > { %647 = vsyncadd (%p466_p9), %s312_s25, 4294967040  ;;  %s21_s17 = sadd.s32 1, %s670_s17   ;;  %s901_s12 = smov %s654_s13 }
  0x75   : > { %p18_p12 = scmp.ge.s32.totalorder %s21_s17, 4   ;;  %s902_s13 = smov %s658_s14 }
  0x76   : > { %s903_s14 = smov %s801_s30  ;;  %s904_s15 = smov %s666_s16 }
  0x77   : > { %s905_s16 = smov %s907_s5  ;;  %20 = sbr.rel (!%p18_p12) target bundleno = 10 (0xa), region = 91 }
  0x7c   :  { %317 = vsyncpa [#allocation3], 1 }
  0x7d   :  { %319 = vsyncpa [#allocation3 + $0x1], 1 }
  0x7e   :  { %320 = vsyncpa [#allocation4], 1 }
  0x7f   :  { %322 = vsyncpa [#allocation4 + $0x1], 1 }
  0x80   :  { %323 = vsyncpa [#allocation5], 1 }
  0x81   :  { %325 = vsyncpa [#allocation5 + $0x1], 1 }
  0x82   :  { %326 = vsyncpa [#allocation6], 1 }
  0x83   :  { %328 = vsyncpa [#allocation6 + $0x1], 1 }

</bundles_post_ra>
